<compile_context>
chip_gen: v5e
topology: v5e:2x2
jax: 0.10.0
libtpu: 0.0.40
codegen_flags: <defaults>
</compile_context>

<pallas_src>
import functools

import jax
import jax.numpy as jnp
from jax.experimental import pallas as pl
from jax.experimental.pallas import tpu as pltpu


def _attention_kernel(true_l, f_ref, a2_ref, we_ref, wf_ref, alpha_ref, wenc_ref):
    bm, L, E = f_ref.shape          # L, E already padded to multiples of 128
    A = we_ref.shape[1]

    f = f_ref[...]                                           # (bm, L, E)

    # Encoder projection: one big MXU matmul over all bm*L rows (L is 8-aligned so
    # the (bm, L, E) -> (bm*L, E) collapse is free).
    att1 = jnp.dot(f.reshape(bm * L, E), we_ref[...],
                   preferred_element_type=jnp.float32)       # (bm*L, A)
    att1 = att1.reshape(bm, L, A)

    # Decoder projection (+ both linear biases) was hoisted to the wrapper: (bm, A).
    comb = jnp.tanh(att1 + a2_ref[...][:, None, :])          # (bm, L, A)

    # full_att projection as VPU multiply + lane reduce over A.  Padded A columns of
    # w_full are zero, so this is exact.  b_full is dropped (uniform score shift).
    scores = jnp.sum(comb * wf_ref[...], axis=-1)            # (bm, L), lane-dense

    # Mask padded L columns before the softmax (exactness of the L padding).
    if true_l < L:
        col = jax.lax.broadcasted_iota(jnp.int32, (bm, L), 1)
        scores = jnp.where(col < true_l, scores, -jnp.inf)

    # Softmax over L (lane axis); normalization via the EUP reciprocal.
    m = jnp.max(scores, axis=-1, keepdims=True)
    e = jnp.exp(scores - m)
    s = jnp.sum(e, axis=-1, keepdims=True)
    alpha = e * pl.reciprocal(s, approx=True)                # (bm, L)
    alpha_ref[...] = alpha

    # Weighted encoding on the VPU/XLU: sum over L of features * alpha.
    # (Replaces the previous per-row M=1 MXU matmuls.)  Padded L rows have alpha ~ 0
    # and zero features, so they contribute nothing.
    wenc = jnp.sum(f.astype(jnp.float32) * alpha[:, :, None], axis=1)   # (bm, E)
    wenc_ref[...] = wenc


def _round_up(x, m):
    return ((x + m - 1) // m) * m


def _pick_bm(B, L_pad, E_pad, A_pad, in_bytes):
    """Largest batch tile (<= 8) whose double-buffered working set fits a conservative
    VMEM budget sized against v7x's 64 MiB physical VMEM.  On v6e/v5e larger tiles are
    possible, but 8 already keeps the MXU matmul wide at captioning shapes."""
    budget = 40 * (1 << 20)
    bm = 1
    for cand in (8, 4, 2, 1):
        per_tile = (2 * cand * L_pad * E_pad * in_bytes        # features (double-buffered)
                    + 2 * cand * L_pad * A_pad * 4             # att1 + comb temporaries
                    + 2 * cand * (L_pad + E_pad) * 4           # alpha + wenc outputs
                    + 2 * (E_pad * A_pad + A_pad) * in_bytes)  # resident weights
        if per_tile <= budget:
            bm = cand
            break
    return min(bm, B)


def attention_forward(features, hidden, params, *, matmul_dtype=jnp.float32):
    """features: (B, L, E) f32; hidden: (B, D) f32.
    Returns (alpha (B, L), weighted_encoding (B, E)) matching the PyTorch module.
    Set matmul_dtype=jnp.bfloat16 to run the MXU matmul (and features DMA) in bf16."""
    B, L, E = features.shape
    A = params["w_enc"].shape[0]
    in_bytes = jnp.dtype(matmul_dtype).itemsize

    # Hoist the decoder projection out of the kernel; fold both linear biases in.
    att2 = hidden @ params["w_dec"].T + params["b_dec"] + params["b_enc"]     # (B, A)

    # Pad to TPU-friendly shapes.  All padding is zeros and is exact: padded E columns
    # of features / rows of W_enc^T contribute 0 to att1; padded A columns of w_full
    # contribute 0 to the scores; padded L columns are masked to -inf in the kernel.
    L_pad = _round_up(L, 128)
    E_pad = _round_up(E, 128)
    A_pad = _round_up(A, 128)

    bm = _pick_bm(B, L_pad, E_pad, A_pad, in_bytes)
    B_pad = _round_up(B, bm)

    feats = features
    if (B_pad, L_pad, E_pad) != (B, L, E):
        feats = jnp.pad(features, ((0, B_pad - B), (0, L_pad - L), (0, E_pad - E)))
    if (B_pad, A_pad) != (B, A):
        att2 = jnp.pad(att2, ((0, B_pad - B), (0, A_pad - A)))

    we_t = params["w_enc"].T                                                  # (E, A)
    if (E_pad, A_pad) != (E, A):
        we_t = jnp.pad(we_t, ((0, E_pad - E), (0, A_pad - A)))
    wf_row = params["w_full"].reshape(1, A)
    if A_pad != A:
        wf_row = jnp.pad(wf_row, ((0, 0), (0, A_pad - A)))
    # b_full dropped: a uniform score shift cannot change softmax(alpha) or the
    # weighted encoding.

    feats = feats.astype(matmul_dtype)
    we_t = we_t.astype(matmul_dtype)

    num_tiles = B_pad // bm

    # Scoped-VMEM estimate; only raise the limit when the default would be tight.
    est = (2 * bm * L_pad * E_pad * in_bytes
           + 2 * bm * L_pad * A_pad * 4
           + 2 * bm * (L_pad + E_pad) * 4
           + 2 * bm * A_pad * 4
           + 2 * (E_pad * A_pad + A_pad) * in_bytes)
    compiler_kwargs = dict(dimension_semantics=("parallel",))
    if est > 12 * (1 << 20):
        compiler_kwargs["vmem_limit_bytes"] = int(min(est * 3 // 2, 96 * (1 << 20)))

    kernel = functools.partial(_attention_kernel, L)

    alpha_p, wenc_p = pl.pallas_call(
        kernel,
        out_shape=(
            jax.ShapeDtypeStruct((B_pad, L_pad), jnp.float32),
            jax.ShapeDtypeStruct((B_pad, E_pad), jnp.float32),
        ),
        grid_spec=pltpu.PrefetchScalarGridSpec(
            num_scalar_prefetch=0,
            grid=(num_tiles,),
            in_specs=[
                pl.BlockSpec((bm, L_pad, E_pad), lambda i: (i, 0, 0)),  # features tile
                pl.BlockSpec((bm, A_pad), lambda i: (i, 0)),            # hoisted att2+biases
                pl.BlockSpec((E_pad, A_pad), lambda i: (0, 0)),         # W_enc^T (resident)
                pl.BlockSpec((1, A_pad), lambda i: (0, 0)),             # w_full row (resident)
            ],
            out_specs=[
                pl.BlockSpec((bm, L_pad), lambda i: (i, 0)),            # alpha, lane-dense
                pl.BlockSpec((bm, E_pad), lambda i: (i, 0)),            # weighted encoding, 2-D
            ],
        ),
        compiler_params=pltpu.CompilerParams(**compiler_kwargs),
    )(feats, att2, we_t, wf_row)

    return alpha_p[:B, :L], wenc_p[:B, :E]


def _reference(features, hidden, params):
    att1 = features @ params["w_enc"].T + params["b_enc"]                    # (B, L, A)
    att2 = hidden @ params["w_dec"].T + params["b_dec"]                      # (B, A)
    combined = jnp.tanh(att1 + att2[:, None, :])
    scores = (combined @ params["w_full"].T + params["b_full"]).squeeze(2)   # (B, L)
    alpha = jax.nn.softmax(scores, axis=1)
    weighted = (features * alpha[:, :, None]).sum(axis=1)
    return alpha, weighted


if __name__ == "__main__":
    # Small shapes consistent with the module's forward.
    B, L = 2, 8                 # batch, number of encoder regions
    ENC, DEC, ATT = 32, 16, 24  # encoder_dim, decoder_dim, attention_dim

    key = jax.random.PRNGKey(0)
    kf, kh, k1, k2, k3, k4, k5, k6 = jax.random.split(key, 8)

    features = jax.random.normal(kf, (B, L, ENC), dtype=jnp.float32)
    hidden = jax.random.normal(kh, (B, DEC), dtype=jnp.float32)

    params = {
        "w_enc": 0.1 * jax.random.normal(k1, (ATT, ENC), dtype=jnp.float32),
        "b_enc": 0.1 * jax.random.normal(k2, (ATT,), dtype=jnp.float32),
        "w_dec": 0.1 * jax.random.normal(k3, (ATT, DEC), dtype=jnp.float32),
        "b_dec": 0.1 * jax.random.normal(k4, (ATT,), dtype=jnp.float32),
        "w_full": 0.1 * jax.random.normal(k5, (1, ATT), dtype=jnp.float32),
        "b_full": 0.1 * jax.random.normal(k6, (1,), dtype=jnp.float32),
    }

    alpha_ref, weighted_ref = _reference(features, hidden, params)

    # f32 MXU inputs: matches the PyTorch module up to the approximate EUP reciprocal
    # used for the softmax normalization.
    alpha, weighted = attention_forward(features, hidden, params)
    jax.block_until_ready((alpha, weighted))
    assert jnp.allclose(alpha, alpha_ref, atol=2e-3, rtol=2e-3)
    assert jnp.allclose(weighted, weighted_ref, atol=2e-3, rtol=2e-3)

    # bf16 MXU inputs (the recommended fast path at captioning-scale shapes): looser
    # tolerance against the f32 reference.
    alpha_bf, weighted_bf = attention_forward(features, hidden, params,
                                              matmul_dtype=jnp.bfloat16)
    jax.block_until_ready((alpha_bf, weighted_bf))
    assert jnp.allclose(alpha_bf, alpha_ref, atol=5e-2, rtol=5e-2)
    assert jnp.allclose(weighted_bf, weighted_ref, atol=5e-2, rtol=5e-2)

    print("KERNEL_OK")
</pallas_src>

<mosaic_0001>
module attributes {stable_mosaic.version = 11 : i64} {
  func.func @_attention_kernel(%arg0: i32, %arg1: memref<2x128x128xf32, #tpu.memory_space<vmem>>, %arg2: memref<2x128xf32, #tpu.memory_space<vmem>>, %arg3: memref<128x128xf32, #tpu.memory_space<vmem>>, %arg4: memref<1x128xf32, #tpu.memory_space<vmem>>, %arg5: memref<2x128xf32, #tpu.memory_space<vmem>>, %arg6: memref<2x128xf32, #tpu.memory_space<vmem>>) attributes {dimension_semantics = [#tpu.dimension_semantics<parallel>], iteration_bounds = array<i64: 1>, scalar_prefetch = 0 : i64, scratch_operands = 0 : i64, tpu.core_type = #tpu.core_type<tc>, window_params = [{transform_indices = @transform_0, window_bounds = array<i64: 2, 128, 128>}, {transform_indices = @transform_1, window_bounds = array<i64: 2, 128>}, {pipeline_mode = #tpu.pipeline_mode<synchronous>, transform_indices = @transform_2, window_bounds = array<i64: 128, 128>}, {pipeline_mode = #tpu.pipeline_mode<synchronous>, transform_indices = @transform_3, window_bounds = array<i64: 1, 128>}, {transform_indices = @transform_4, window_bounds = array<i64: 2, 128>}, {transform_indices = @transform_5, window_bounds = array<i64: 2, 128>}]} {
    %c0 = arith.constant 0 : index
    %c0_0 = arith.constant 0 : index
    %c0_1 = arith.constant 0 : index
    %0 = vector.load %arg1[%c0, %c0_0, %c0_1] : memref<2x128x128xf32, #tpu.memory_space<vmem>>, vector<2x128x128xf32>
    %1 = vector.shape_cast %0 : vector<2x128x128xf32> to vector<256x128xf32>
    %c0_2 = arith.constant 0 : index
    %c0_3 = arith.constant 0 : index
    %2 = vector.load %arg3[%c0_2, %c0_3] : memref<128x128xf32, #tpu.memory_space<vmem>>, vector<128x128xf32>
    %cst = arith.constant dense<0.000000e+00> : vector<256x128xf32>
    %3 = tpu.matmul %1, %2, %cst {dimension_numbers = #tpu.dot_dimension_numbers<[1], [0], [0], [1], [0, 0, 1, 1], [], []>} : vector<256x128xf32>, vector<128x128xf32>, vector<256x128xf32> -> vector<256x128xf32>
    %4 = vector.shape_cast %3 : vector<256x128xf32> to vector<2x128x128xf32>
    %c0_4 = arith.constant 0 : index
    %c0_5 = arith.constant 0 : index
    %5 = vector.load %arg2[%c0_4, %c0_5] : memref<2x128xf32, #tpu.memory_space<vmem>>, vector<2x128xf32>
    %6 = vector.shape_cast %5 : vector<2x128xf32> to vector<2x1x128xf32>
    %7 = vector.broadcast %6 : vector<2x1x128xf32> to vector<2x128x128xf32>
    %8 = arith.addf %4, %7 : vector<2x128x128xf32>
    %9 = math.tanh %8 : vector<2x128x128xf32>
    %c0_6 = arith.constant 0 : index
    %c0_7 = arith.constant 0 : index
    %10 = vector.load %arg4[%c0_6, %c0_7] : memref<1x128xf32, #tpu.memory_space<vmem>>, vector<1x128xf32>
    %11 = vector.shape_cast %10 : vector<1x128xf32> to vector<1x1x128xf32>
    %12 = vector.broadcast %11 : vector<1x1x128xf32> to vector<2x128x128xf32>
    %13 = arith.mulf %9, %12 : vector<2x128x128xf32>
    %cst_8 = arith.constant dense<0.000000e+00> : vector<2x128xf32>
    %14 = vector.multi_reduction <add>, %13, %cst_8 [2] : vector<2x128x128xf32> to vector<2x128xf32>
    %15 = tpu.iota {dimensions = array<i32: 1>} : vector<2x128xi32>
    %c8_i32 = arith.constant 8 : i32
    %16 = vector.broadcast %c8_i32 : i32 to vector<2x128xi32>
    %17 = arith.cmpi slt, %15, %16 : vector<2x128xi32>
    %cst_9 = arith.constant 0xFF800000 : f32
    %18 = vector.broadcast %cst_9 : f32 to vector<2x128xf32>
    %19 = arith.select %17, %14, %18 : vector<2x128xi1>, vector<2x128xf32>
    %cst_10 = arith.constant dense<0xFF800000> : vector<2xf32>
    %20 = vector.multi_reduction <maximumf>, %19, %cst_10 [1] : vector<2x128xf32> to vector<2xf32>
    %21 = vector.shape_cast %20 : vector<2xf32> to vector<2x1xf32>
    %22 = vector.broadcast %21 : vector<2x1xf32> to vector<2x128xf32>
    %23 = arith.subf %19, %22 : vector<2x128xf32>
    %24 = math.exp %23 : vector<2x128xf32>
    %cst_11 = arith.constant dense<0.000000e+00> : vector<2xf32>
    %25 = vector.multi_reduction <add>, %24, %cst_11 [1] : vector<2x128xf32> to vector<2xf32>
    %26 = vector.shape_cast %25 : vector<2xf32> to vector<2x1xf32>
    %27 = tpu.reciprocal %26 {approx = true} : vector<2x1xf32> -> vector<2x1xf32>
    %28 = vector.broadcast %27 : vector<2x1xf32> to vector<2x128xf32>
    %29 = arith.mulf %24, %28 : vector<2x128xf32>
    %c0_12 = arith.constant 0 : index
    %c0_13 = arith.constant 0 : index
    %30 = vector.load %arg5[%c0_12, %c0_13] : memref<2x128xf32, #tpu.memory_space<vmem>>, vector<2x128xf32>
    tpu.vector_store %arg5[%c0_12, %c0_13], %29 {strides = array<i32>} : memref<2x128xf32, #tpu.memory_space<vmem>>, vector<2x128xf32>,
    %31 = vector.shape_cast %29 : vector<2x128xf32> to vector<2x128x1xf32>
    %32 = vector.broadcast %31 : vector<2x128x1xf32> to vector<2x128x128xf32>
    %33 = arith.mulf %0, %32 : vector<2x128x128xf32>
    %cst_14 = arith.constant dense<0.000000e+00> : vector<2x128xf32>
    %34 = vector.multi_reduction <add>, %33, %cst_14 [1] : vector<2x128x128xf32> to vector<2x128xf32>
    %c0_15 = arith.constant 0 : index
    %c0_16 = arith.constant 0 : index
    %35 = vector.load %arg6[%c0_15, %c0_16] : memref<2x128xf32, #tpu.memory_space<vmem>>, vector<2x128xf32>
    tpu.vector_store %arg6[%c0_15, %c0_16], %34 {strides = array<i32>} : memref<2x128xf32, #tpu.memory_space<vmem>>, vector<2x128xf32>,
    return
  }
  func.func @transform_0(%arg0: i32) -> (i32, i32, i32) {
    %c0_i32 = arith.constant 0 : i32
    %c0_i32_0 = arith.constant 0 : i32
    %c0_i32_1 = arith.constant 0 : i32
    return %arg0, %c0_i32, %c0_i32_0 : i32, i32, i32
  }
  func.func @transform_1(%arg0: i32) -> (i32, i32) {
    %c0_i32 = arith.constant 0 : i32
    %c0_i32_0 = arith.constant 0 : i32
    return %arg0, %c0_i32 : i32, i32
  }
  func.func @transform_2(%arg0: i32) -> (i32, i32) {
    %c0_i32 = arith.constant 0 : i32
    %c0_i32_0 = arith.constant 0 : i32
    %c0_i32_1 = arith.constant 0 : i32
    return %c0_i32, %c0_i32_0 : i32, i32
  }
  func.func @transform_3(%arg0: i32) -> (i32, i32) {
    %c0_i32 = arith.constant 0 : i32
    %c0_i32_0 = arith.constant 0 : i32
    %c0_i32_1 = arith.constant 0 : i32
    return %c0_i32, %c0_i32_0 : i32, i32
  }
  func.func @transform_4(%arg0: i32) -> (i32, i32) {
    %c0_i32 = arith.constant 0 : i32
    %c0_i32_0 = arith.constant 0 : i32
    return %arg0, %c0_i32 : i32, i32
  }
  func.func @transform_5(%arg0: i32) -> (i32, i32) {
    %c0_i32 = arith.constant 0 : i32
    %c0_i32_0 = arith.constant 0 : i32
    return %arg0, %c0_i32 : i32, i32
  }
}

</mosaic_0001>

<bundles_post_ra>
// kernel: tpu_custom_call.1
= control target key start
LH: loop header
LB: loop body
LE: loop exit
PB: predicated region body
PF: predicated region fallthrough
CT: control target
= control target key end

     0   :  { %11 = vsyncpa [#allocation3], 0  ;;  %s1470_s0 = inlined_call_operand.hbm [shape: f32[2,128,128], index: 0, kind: input, shape index: {}]   ;;  %s1471_s1 = inlined_call_operand.hbm [shape: f32[2,128], index: 1, kind: input, shape index: {}]   ;;  %s1472_s2 = inlined_call_operand.hbm [shape: f32[128,128], index: 2, kind: input, shape index: {}]   ;;  %s1473_s3 = inlined_call_operand.vmem [shape: f32[1,128], index: 3, kind: input, shape index: {}]   ;;  %s1474_s4 = inlined_call_operand.hbm [shape: f32[2,128], index: 4, kind: output, shape index: {0}]   ;;  %s1475_s5 = inlined_call_operand.hbm [shape: f32[2,128], index: 5, kind: output, shape index: {1}]  }
   0x1   :  { %12 = vsyncpa [#allocation6], 0 }
   0x2   :  { %13 = vsyncpa [#allocation4], 0  ;;  %s33_s20 = sshll.u32 %s1471_s1, 4  ;;  %s34_s20 = int_to_ptr.hbm [resolvable:$true] %s33_s20 }
   0x3   :  { %14 = vsyncpa [#allocation10], 0  ;;  %s1152_s21 = smov [#allocation5]   ;;  %s19_s25 = sshll.u32 %s1470_s0, 4  ;;  %s20_s25 = int_to_ptr.hbm [resolvable:$true] %s19_s25 }
   0x4   :  { %s35_s22 = sshll.u32 %s1152_s21, 4  ;;  %s1153_s26 = smov [#allocation2]   ;;  %s36_s22 = int_to_ptr.vmem [resolvable:$true] %s35_s22 }
   0x5   :  { %38 = dma.hbm_to_vmem [thread:$0]  %s34_s20, 32, %s36_s22, [#allocation6]  }
   0x6   :  { %s21_s27 = sshll.u32 %s1153_s26, 4  ;;  %s1154_s28 = smov 128   ;;  %s22_s27 = int_to_ptr.vmem [resolvable:$true] %s21_s27 }
   0x7   :  { %s1155_s29 = smov 8   ;;  %s43_s1 = sshll.u32 %s1472_s2, 4  ;;  %s44_s1 = int_to_ptr.hbm [resolvable:$true] %s43_s1 }
   0x8   :  { %27 = dma.hbm_to_vmem [thread:$0]  %s20_s25, 4096, %s22_s27, [#allocation3], %s1154_s28, %s1154_s28, %s1155_s29  }
   0x9   :  { %s1156_s7 = smov [#allocation7]  }
   0xa   :  { %s45_s8 = sshll.u32 %s1156_s7, 4  ;;  %s46_s8 = int_to_ptr.vmem [resolvable:$true] %s45_s8 }
   0xb   :  { %51 = dma.hbm_to_vmem [thread:$0]  %s44_s1, 2048, %s46_s8, [#allocation6], %s1154_s28, %s1154_s28, %s1155_s29  }
   0xc   :  { %1144 = dma.done.wait [#allocation3], 4096  }
   0xd   :  { %1145 = vsyncadd [#allocation3], 4294963200 }
   0xe   :  { %1146 = dma.done.wait [#allocation6], 2080  }
   0xf   :  { %1147 = vsyncadd [#allocation6], 4294965216  ;;  %v113_v0 = vld [vmem:[#allocation7 + $0x78] sm:$0xff]  ;;  %v112_v1 = vld [vmem:[#allocation7 + $0x70] sm:$0xff]  ;;  %vm436_vm0 = vcmask 130112   ;;  %vm440_vm1 = vcmask 195712  }
  0x10   :  { %114 = vmatpush.msra.mxu0 %v113_v0  ;;  %850 = vmatpush.msra.mxu2 %v113_v0  ;;  %v111_v2 = vld [vmem:[#allocation7 + $0x68] sm:$0xff]  ;;  %v110_v3 = vld [vmem:[#allocation7 + $0x60] sm:$0xff]  ;;  %v109_v4 = vld [vmem:[#allocation7 + $0x58] sm:$0xff]  ;;  %vm444_vm2 = vcmask 261312   ;;  %vm448_vm3 = vcmask 326912   ;;  %vm452_vm4 = vcmask 392512  }
  0x11   :  { %851 = vmatpush.msra.mxu3 %v113_v0  ;;  %849 = vmatpush.msra.mxu1 %v113_v0  ;;  %v108_v5 = vld [vmem:[#allocation7 + $0x50] sm:$0xff]  ;;  %v107_v6 = vld [vmem:[#allocation7 + $0x48] sm:$0xff]  ;;  %v106_v7 = vld [vmem:[#allocation7 + $0x40] sm:$0xff]  ;;  %vm460_vm5 = vcmask 523712   ;;  %vm456_vm6 = vcmask 458112   ;;  %vm464_vm7 = vcmask 589312  }
  0x12   :  { %115 = vmatpush.msra.mxu0 %v112_v1  ;;  %853 = vmatpush.msra.mxu2 %v112_v1  ;;  %v105_v8 = vld [vmem:[#allocation7 + $0x38] sm:$0xff]  ;;  %v104_v9 = vld [vmem:[#allocation7 + $0x30] sm:$0xff]  ;;  %v103_v10 = vld [vmem:[#allocation7 + $0x28] sm:$0xff]  ;;  %vm468_vm8 = vcmask 654912   ;;  %vm472_vm9 = vcmask 720512   ;;  %vm476_vm10 = vcmask 786112  }
  0x13   :  { %854 = vmatpush.msra.mxu3 %v112_v1  ;;  %852 = vmatpush.msra.mxu1 %v112_v1  ;;  %v102_v11 = vld [vmem:[#allocation7 + $0x20] sm:$0xff]  ;;  %v101_v12 = vld [vmem:[#allocation7 + $0x18] sm:$0xff]  ;;  %v100_v13 = vld [vmem:[#allocation7 + $0x10] sm:$0xff]  ;;  %vm480_vm11 = vcmask 851712   ;;  %vm484_vm12 = vcmask 917312   ;;  %vm488_vm13 = vcmask 982912  }
  0x14   :  { %116 = vmatpush.msra.mxu0 %v111_v2  ;;  %856 = vmatpush.msra.mxu2 %v111_v2  ;;  %v99_v14 = vld [vmem:[#allocation7 + $0x8] sm:$0xff]  ;;  %v98_v15 = vld [vmem:[#allocation7] sm:$0xff]  ;;  %v1210_v28 = vld [vmem:[#allocation2 + $0x18] sm:$0xff]  ;;  %vm492_vm14 = vcmask 1048512   ;;  %vm525_vm15 = vcmask 1041409   ;;  %s822_s10 = sshll.u32 %s1474_s4, 4  ;;  %s823_s10 = int_to_ptr.hbm [resolvable:$true] %s822_s10 }
  0x15   :  { %857 = vmatpush.msra.mxu3 %v111_v2  ;;  %855 = vmatpush.msra.mxu1 %v111_v2  ;;  %v1198_v16 = vld [vmem:[#allocation2] sm:$0xff]  ;;  %v1201_v20 = vld [vmem:[#allocation2 + $0x8] sm:$0xff]  ;;  %v1204_v24 = vld [vmem:[#allocation2 + $0x10] sm:$0xff]  ;;  %s1157_s11 = smov [#allocation8]   ;;  %s1158_s4 = smov [#allocation9]  }
  0x16   :  { %117 = vmatpush.msra.mxu0 %v110_v3  ;;  %859 = vmatpush.msra.mxu2 %v110_v3  ;;  %v82_v17 = vld [vmem:[#allocation2 + $0x80] sm:$0xff]  ;;  %v83_v21 = vld [vmem:[#allocation2 + $0x88] sm:$0xff]  ;;  %v92_v25 = vld [vmem:[#allocation2 + $0xd0] sm:$0xff]  ;;  %s820_s12 = sshll.u32 %s1157_s11, 4  ;;  %s831_s13 = sshll.u32 %s1158_s4, 4  ;;  %s821_s12 = int_to_ptr.vmem [resolvable:$true] %s820_s12  ;;  %s832_s13 = int_to_ptr.vmem [resolvable:$true] %s831_s13 }
  0x17   :  { %860 = vmatpush.msra.mxu3 %v110_v3  ;;  %858 = vmatpush.msra.mxu1 %v110_v3  ;;  %v90_v18 = vld [vmem:[#allocation2 + $0xc0] sm:$0xff]  ;;  %v91_v22 = vld [vmem:[#allocation2 + $0xc8] sm:$0xff]  ;;  %v1206_v26 = vld [vmem:[#allocation2 + $0x90] sm:$0xff]  ;;  %s833_s16 = sshll.u32 %s1475_s5, 4  ;;  %s834_s16 = int_to_ptr.hbm [resolvable:$true] %s833_s16 }
  0x18   :  { %118 = vmatpush.msra.mxu0 %v109_v4  ;;  %862 = vmatpush.msra.mxu2 %v109_v4  ;;  %v74_v19 = vld [vmem:[#allocation2 + $0x40] sm:$0xff]  ;;  %v75_v23 = vld [vmem:[#allocation2 + $0x48] sm:$0xff]  ;;  %v76_v27 = vld [vmem:[#allocation2 + $0x50] sm:$0xff] }
  0x19   :  { %863 = vmatpush.msra.mxu3 %v109_v4  ;;  %861 = vmatpush.msra.mxu1 %v109_v4  ;;  %v1212_v29 = vld [vmem:[#allocation2 + $0x98] sm:$0xff]  ;;  %v1216_v32 = vld [vmem:[#allocation2 + $0x20] sm:$0xff]  ;;  %v1222_v36 = vld [vmem:[#allocation2 + $0x28] sm:$0xff] }
  0x1a   :  { %119 = vmatpush.msra.mxu0 %v108_v5  ;;  %865 = vmatpush.msra.mxu2 %v108_v5  ;;  %v93_v30 = vld [vmem:[#allocation2 + $0xd8] sm:$0xff]  ;;  %v1218_v33 = vld [vmem:[#allocation2 + $0xa0] sm:$0xff]  ;;  %v1224_v37 = vld [vmem:[#allocation2 + $0xa8] sm:$0xff] }
  0x1b   :  { %866 = vmatpush.msra.mxu3 %v108_v5  ;;  %864 = vmatpush.msra.mxu1 %v108_v5  ;;  %v77_v31 = vld [vmem:[#allocation2 + $0x58] sm:$0xff]  ;;  %v94_v34 = vld [vmem:[#allocation2 + $0xe0] sm:$0xff]  ;;  %v95_v38 = vld [vmem:[#allocation2 + $0xe8] sm:$0xff] }
  0x1c   :  { %120 = vmatpush.msra.mxu0 %v107_v6  ;;  %868 = vmatpush.msra.mxu2 %v107_v6  ;;  %v78_v35 = vld [vmem:[#allocation2 + $0x60] sm:$0xff]  ;;  %v79_v39 = vld [vmem:[#allocation2 + $0x68] sm:$0xff]  ;;  %v1228_v40 = vld [vmem:[#allocation2 + $0x30] sm:$0xff] }
  0x1d   :  { %869 = vmatpush.msra.mxu3 %v107_v6  ;;  %867 = vmatpush.msra.mxu1 %v107_v6  ;;  %v1230_v41 = vld [vmem:[#allocation2 + $0xb0] sm:$0xff]  ;;  %v1234_v44 = vld [vmem:[#allocation2 + $0x38] sm:$0xff]  ;;  %v227_v48 = vld [vmem:[#allocation5] sm:$0x3] }
  0x1e   :  { %121 = vmatpush.msra.mxu0 %v106_v7  ;;  %871 = vmatpush.msra.mxu2 %v106_v7  ;;  %v96_v42 = vld [vmem:[#allocation2 + $0xf0] sm:$0xff]  ;;  %v1236_v45 = vld [vmem:[#allocation2 + $0xb8] sm:$0xff]  ;;  %v1240_v49 = vperm.slane %v227_v48, 0  ;;  %v229_v51 = vrot.slane %v227_v48, 1  ;;  %v1249_v56 = vld [vmem:[%s1473_s3] ss:$0 sm:$0xff] }
  0x1f   :  { %872 = vmatpush.msra.mxu3 %v106_v7  ;;  %870 = vmatpush.msra.mxu1 %v106_v7  ;;  %v80_v43 = vld [vmem:[#allocation2 + $0x70] sm:$0xff]  ;;  %v97_v46 = vld [vmem:[#allocation2 + $0xf8] sm:$0xff] }
  0x20   :  { %122 = vmatpush.msra.mxu0 %v105_v8  ;;  %874 = vmatpush.msra.mxu2 %v105_v8  ;;  %v81_v47 = vld [vmem:[#allocation2 + $0x78] sm:$0xff]  ;;  %v1244_v55 = vperm.slane %v229_v51, 0 }
  0x21   :  { %875 = vmatpush.msra.mxu3 %v105_v8  ;;  %873 = vmatpush.msra.mxu1 %v105_v8 }
  0x22   :  { %123 = vmatpush.msra.mxu0 %v104_v9  ;;  %877 = vmatpush.msra.mxu2 %v104_v9 }
  0x23   :  { %878 = vmatpush.msra.mxu3 %v104_v9  ;;  %876 = vmatpush.msra.mxu1 %v104_v9 }
  0x24   :  { %124 = vmatpush.msra.mxu0 %v103_v10  ;;  %880 = vmatpush.msra.mxu2 %v103_v10 }
  0x25   :  { %881 = vmatpush.msra.mxu3 %v103_v10  ;;  %879 = vmatpush.msra.mxu1 %v103_v10 }
  0x26   :  { %125 = vmatpush.msra.mxu0 %v102_v11  ;;  %883 = vmatpush.msra.mxu2 %v102_v11 }
  0x27   :  { %884 = vmatpush.msra.mxu3 %v102_v11  ;;  %882 = vmatpush.msra.mxu1 %v102_v11 }
  0x28   :  { %126 = vmatpush.msra.mxu0 %v101_v12  ;;  %886 = vmatpush.msra.mxu2 %v101_v12 }
  0x29   :  { %887 = vmatpush.msra.mxu3 %v101_v12  ;;  %885 = vmatpush.msra.mxu1 %v101_v12 }
  0x2a   :  { %127 = vmatpush.msra.mxu0 %v100_v13  ;;  %889 = vmatpush.msra.mxu2 %v100_v13 }
  0x2b   :  { %890 = vmatpush.msra.mxu3 %v100_v13  ;;  %888 = vmatpush.msra.mxu1 %v100_v13 }
  0x2c   :  { %128 = vmatpush.msra.mxu0 %v99_v14  ;;  %892 = vmatpush.msra.mxu2 %v99_v14 }
  0x2d   :  { %893 = vmatpush.msra.mxu3 %v99_v14  ;;  %891 = vmatpush.msra.mxu1 %v99_v14 }
  0x2e   :  { %129 = vmatpush.msra.mxu0 %v98_v15  ;;  %895 = vmatpush.msra.mxu2 %v98_v15 }
  0x2f   :  { %896 = vmatpush.msra.mxu3 %v98_v15  ;;  %130 = vmatmul.f32.vlgmr.msra.gmra.mxu0 %v1198_v16 }
  0x30   :  { %178 = vmatmul.f32.vlgmr.msra.gmra.mxu2 %v82_v17  ;;  %202 = vmatmul.f32.vlgmr.msra.gmra.mxu3 %v90_v18 }
  0x31   :  { %894 = vmatpush.msra.mxu1 %v98_v15 }
  0x32   :  { %154 = vmatmul.f32.vlgmr.msra.gmra.mxu1 %v74_v19 }
  0x37   :  { %133 = vmatmul.f32.gmra.mxu0 %v1201_v20 }
  0x38   :  { %181 = vmatmul.f32.gmra.mxu2 %v83_v21  ;;  %205 = vmatmul.f32.gmra.mxu3 %v91_v22 }
  0x3a   :  { %157 = vmatmul.f32.gmra.mxu1 %v75_v23 }
  0x3f   :  { %136 = vmatmul.f32.gmra.mxu0 %v1204_v24 }
  0x40   :  { %208 = vmatmul.f32.gmra.mxu3 %v92_v25  ;;  %184 = vmatmul.f32.gmra.mxu2 %v1206_v26 }
  0x42   :  { %160 = vmatmul.f32.gmra.mxu1 %v76_v27 }
  0x47   :  { %139 = vmatmul.f32.gmra.mxu0 %v1210_v28 }
  0x48   :  { %187 = vmatmul.f32.gmra.mxu2 %v1212_v29  ;;  %211 = vmatmul.f32.gmra.mxu3 %v93_v30 }
  0x4a   :  { %163 = vmatmul.f32.gmra.mxu1 %v77_v31 }
  0x4f   :  { %142 = vmatmul.f32.gmra.mxu0 %v1216_v32 }
  0x50   :  { %190 = vmatmul.f32.gmra.mxu2 %v1218_v33  ;;  %214 = vmatmul.f32.gmra.mxu3 %v94_v34 }
  0x52   :  { %166 = vmatmul.f32.gmra.mxu1 %v78_v35 }
  0x57   :  { %145 = vmatmul.f32.gmra.mxu0 %v1222_v36 }
  0x58   :  { %193 = vmatmul.f32.gmra.mxu2 %v1224_v37  ;;  %217 = vmatmul.f32.gmra.mxu3 %v95_v38 }
  0x5a   :  { %169 = vmatmul.f32.gmra.mxu1 %v79_v39 }
  0x5f   :  { %148 = vmatmul.f32.gmra.mxu0 %v1228_v40 }
  0x60   :  { %196 = vmatmul.f32.gmra.mxu2 %v1230_v41  ;;  %220 = vmatmul.f32.gmra.mxu3 %v96_v42 }
  0x62   :  { %172 = vmatmul.f32.gmra.mxu1 %v80_v43 }
  0x67   :  { %151 = vmatmul.f32.gmra.mxu0 %v1234_v44 }
  0x68   :  { %199 = vmatmul.f32.gmra.mxu2 %v1236_v45  ;;  %223 = vmatmul.f32.gmra.mxu3 %v97_v46 }
  0x6a   :  { %175 = vmatmul.f32.gmra.mxu1 %v81_v47 }
  0xac   :  { %v131_v50 = vpop.f32.mrf.mxu0 }
  0xad   :  { %v234_v52 = vadd.f32 %v1240_v49, %v131_v50 }
  0xaf   :  { %938 = vtanh.f32 %v234_v52  ;;  %v155_v53 = vpop.f32.mrf.mxu1 }
  0xb0   :  { %v242_v54 = vadd.f32 %v1240_v49, %v155_v53 }
  0xb2   :  { %940 = vtanh.f32 %v242_v54 }
  0xb3   :  { %v179_v57 = vpop.f32.mrf.mxu2  ;;  %v203_v58 = vpop.f32.mrf.mxu3 }
  0xb4   :  { %v250_v59 = vadd.f32 %v1244_v55, %v179_v57  ;;  %v258_v60 = vadd.f32 %v1244_v55, %v203_v58  ;;  %v134_v61 = vpop.f32.mrf.mxu0 }
  0xb5   :  { %v939_v62 = vpop.eup %938  ;;  %v235_v2 = vadd.f32 %v1240_v49, %v134_v61 }
  0xb6   :  { %942 = vtanh.f32 %v250_v59  ;;  %v302_v63 = vmul.f32 %v939_v62, %v1249_v56 }
  0xb7   :  { %944 = vtanh.f32 %v258_v60  ;;  %v158_v0 = vpop.f32.mrf.mxu1 }
  0xb8   :  { %v941_v1 = vpop.eup %940  ;;  %334 = vadd.xlane.f32.xlu0 %v302_v63  ;;  %946 = vtanh.f32 %v235_v2  ;;  %v243_v15 = vadd.f32 %v1240_v49, %v158_v0 }
  0xb9   :  { %v310_v3 = vmul.f32 %v941_v1, %v1249_v56 }
  0xbb   :  { %v182_v4 = vpop.f32.mrf.mxu2  ;;  %v206_v5 = vpop.f32.mrf.mxu3  ;;  %350 = vadd.xlane.f32.xlu2 %v310_v3 }
  0xbc   :  { %v943_v6 = vpop.eup %942  ;;  %v251_v7 = vadd.f32 %v1244_v55, %v182_v4  ;;  %v259_v8 = vadd.f32 %v1244_v55, %v206_v5  ;;  %v137_v9 = vpop.f32.mrf.mxu0 }
  0xbd   :  { %v945_v10 = vpop.eup %944  ;;  %v318_v11 = vmul.f32 %v943_v6, %v1249_v56  ;;  %v236_v13 = vadd.f32 %v1240_v49, %v137_v9 }
  0xbe   :  { %948 = vtanh.f32 %v251_v7  ;;  %v326_v12 = vmul.f32 %v945_v10, %v1249_v56  ;;  %v947_v17 = vpop.eup %946 }
  0xbf   :  { %950 = vtanh.f32 %v259_v8  ;;  %366 = vadd.xlane.f32.xlu1 %v318_v11  ;;  %v161_v14 = vpop.f32.mrf.mxu1  ;;  %v303_v31 = vmul.f32 %v947_v17, %v1249_v56 }
  0xc0   :  { %382 = vadd.xlane.f32.xlu0 %v326_v12  ;;  %952 = vtanh.f32 %v236_v13  ;;  %v244_v42 = vadd.f32 %v1240_v49, %v161_v14 }
  0xc1   :  { %954 = vtanh.f32 %v243_v15 }
  0xc3   :  { %v209_v18 = vpop.f32.mrf.mxu3  ;;  %v185_v19 = vpop.f32.mrf.mxu2 }
  0xc4   :  { %v949_v21 = vpop.eup %948  ;;  %v260_v22 = vadd.f32 %v1244_v55, %v209_v18  ;;  %v140_v23 = vpop.f32.mrf.mxu0  ;;  %v252_v35 = vadd.f32 %v1244_v55, %v185_v19 }
  0xc5   :  { %v951_v25 = vpop.eup %950  ;;  %v319_v27 = vmul.f32 %v949_v21, %v1249_v56  ;;  %v237_v61 = vadd.f32 %v1240_v49, %v140_v23 }
  0xc6   :  { %956 = vtanh.f32 %v260_v22  ;;  %v327_v30 = vmul.f32 %v951_v25, %v1249_v56  ;;  %v953_v39 = vpop.eup %952 }
  0xc7   :  { %368 = vadd.xlane.f32.xlu2 %v319_v27  ;;  %v164_v34 = vpop.f32.mrf.mxu1  ;;  %v955_v43 = vpop.eup %954  ;;  %v304_v50 = vmul.f32 %v953_v39, %v1249_v56 }
  0xc8   :  { %384 = vadd.xlane.f32.xlu1 %v327_v30  ;;  %336 = vadd.xlane.f32.xlu0 %v303_v31  ;;  %v245_v38 = vadd.f32 %v1240_v49, %v164_v34  ;;  %v311_v53 = vmul.f32 %v955_v43, %v1249_v56 }
  0xca   :  { %958 = vtanh.f32 %v245_v38 }
  0xcb   :  { %960 = vtanh.f32 %v252_v35  ;;  %v188_v46 = vpop.f32.mrf.mxu2  ;;  %v212_v47 = vpop.f32.mrf.mxu3 }
  0xcc   :  { %v957_v48 = vpop.eup %956  ;;  %v143_v51 = vpop.f32.mrf.mxu0  ;;  %962 = vtanh.f32 %v244_v42  ;;  %v261_v57 = vadd.f32 %v1244_v55, %v212_v47  ;;  %v253_v11 = vadd.f32 %v1244_v55, %v188_v46 }
  0xcd   :  { %v328_v52 = vmul.f32 %v957_v48, %v1249_v56  ;;  %v238_v54 = vadd.f32 %v1240_v49, %v143_v51 }
  0xcf   :  { %386 = vadd.xlane.f32.xlu2 %v328_v52  ;;  %v167_v58 = vpop.f32.mrf.mxu1  ;;  %964 = vtanh.f32 %v238_v54 }
  0xd0   :  { %v959_v59 = vpop.eup %958  ;;  %338 = vadd.xlane.f32.xlu1 %v304_v50  ;;  %352 = vadd.xlane.f32.xlu0 %v311_v53  ;;  %966 = vtanh.f32 %v261_v57  ;;  %v246_v6 = vadd.f32 %v1240_v49, %v167_v58 }
  0xd1   :  { %v961_v60 = vpop.eup %960  ;;  %v313_v63 = vmul.f32 %v959_v59, %v1249_v56  ;;  %968 = vtanh.f32 %v237_v61 }
  0xd2   :  { %v963_v62 = vpop.eup %962  ;;  %v320_v2 = vmul.f32 %v961_v60, %v1249_v56 }
  0xd3   :  { %v191_v0 = vpop.f32.mrf.mxu2  ;;  %v215_v1 = vpop.f32.mrf.mxu3  ;;  %v312_v5 = vmul.f32 %v963_v62, %v1249_v56 }
  0xd4   :  { %v146_v3 = vpop.f32.mrf.mxu0  ;;  %v254_v4 = vadd.f32 %v1244_v55, %v191_v0  ;;  %v262_v22 = vadd.f32 %v1244_v55, %v215_v1 }
  0xd5   :  { %v965_v8 = vpop.eup %964  ;;  %v239_v12 = vadd.f32 %v1240_v49, %v146_v3 }
  0xd6   :  { %v967_v10 = vpop.eup %966  ;;  %970 = vtanh.f32 %v254_v4  ;;  %v306_v14 = vmul.f32 %v965_v8, %v1249_v56 }
  0xd7   :  { %356 = vadd.xlane.f32.xlu2 %v313_v63  ;;  %v170_v7 = vpop.f32.mrf.mxu1  ;;  %v969_v13 = vpop.eup %968  ;;  %v329_v18 = vmul.f32 %v967_v10, %v1249_v56 }
  0xd8   :  { %354 = vadd.xlane.f32.xlu1 %v312_v5  ;;  %370 = vadd.xlane.f32.xlu0 %v320_v2  ;;  %v247_v9 = vadd.f32 %v1240_v49, %v170_v7  ;;  %v305_v25 = vmul.f32 %v969_v13, %v1249_v56 }
  0xda   :  { %972 = vtanh.f32 %v247_v9 }
  0xdb   :  { %974 = vtanh.f32 %v246_v6  ;;  %v194_v15 = vpop.f32.mrf.mxu2  ;;  %v218_v17 = vpop.f32.mrf.mxu3 }
  0xdc   :  { %v149_v19 = vpop.f32.mrf.mxu0  ;;  %v263_v21 = vadd.f32 %v1244_v55, %v218_v17  ;;  %976 = vtanh.f32 %v253_v11  ;;  %v971_v27 = vpop.eup %970  ;;  %v255_v30 = vadd.f32 %v1244_v55, %v194_v15 }
  0xdd   :  { %v240_v23 = vadd.f32 %v1240_v49, %v149_v19  ;;  %978 = vtanh.f32 %v239_v12  ;;  %v322_v43 = vmul.f32 %v971_v27, %v1249_v56 }
  0xdf   :  { %342 = vadd.xlane.f32.xlu2 %v306_v14  ;;  %v173_v31 = vpop.f32.mrf.mxu1  ;;  %980 = vtanh.f32 %v240_v23 }
  0xe0   :  { %v973_v34 = vpop.eup %972  ;;  %340 = vadd.xlane.f32.xlu1 %v305_v25  ;;  %388 = vadd.xlane.f32.xlu0 %v329_v18  ;;  %v248_v35 = vadd.f32 %v1240_v49, %v173_v31  ;;  %982 = vtanh.f32 %v263_v21 }
  0xe1   :  { %v975_v38 = vpop.eup %974  ;;  %984 = vtanh.f32 %v262_v22  ;;  %v315_v39 = vmul.f32 %v973_v34, %v1249_v56 }
  0xe2   :  { %986 = vtanh.f32 %v248_v35  ;;  %v977_v42 = vpop.eup %976  ;;  %v314_v50 = vmul.f32 %v975_v38, %v1249_v56 }
  0xe3   :  { %988 = vtanh.f32 %v255_v30  ;;  %v197_v46 = vpop.f32.mrf.mxu2  ;;  %v221_v47 = vpop.f32.mrf.mxu3  ;;  %v321_v59 = vmul.f32 %v977_v42, %v1249_v56 }
  0xe4   :  { %v979_v48 = vpop.eup %978  ;;  %v256_v51 = vadd.f32 %v1244_v55, %v197_v46  ;;  %v152_v52 = vpop.f32.mrf.mxu0  ;;  %v264_v53 = vadd.f32 %v1244_v55, %v221_v47 }
  0xe5   :  { %v981_v54 = vpop.eup %980  ;;  %v241_v57 = vadd.f32 %v1240_v49, %v152_v52  ;;  %v307_v4 = vmul.f32 %v979_v48, %v1249_v56 }
  0xe6   :  { %v983_v58 = vpop.eup %982  ;;  %990 = vtanh.f32 %v256_v51  ;;  %v308_v60 = vmul.f32 %v981_v54, %v1249_v56  ;;  %v398_v54 = vlaneseq }
  0xe7   :  { %v985_v61 = vpop.eup %984  ;;  %374 = vadd.xlane.f32.xlu2 %v322_v43  ;;  %v176_v62 = vpop.f32.mrf.mxu1  ;;  %992 = vtanh.f32 %v241_v57  ;;  %v331_v63 = vmul.f32 %v983_v58, %v1249_v56 }
  0xe8   :  { %v987_v0 = vpop.eup %986  ;;  %372 = vadd.xlane.f32.xlu1 %v321_v59  ;;  %358 = vadd.xlane.f32.xlu0 %v314_v50  ;;  %v249_v1 = vadd.f32 %v1240_v49, %v176_v62  ;;  %994 = vtanh.f32 %v264_v53  ;;  %v330_v8 = vmul.f32 %v985_v61, %v1249_v56 }
  0xe9   :  { %v989_v2 = vpop.eup %988  ;;  %v316_v3 = vmul.f32 %v987_v0, %v1249_v56 }
  0xea   :  { %996 = vtanh.f32 %v249_v1  ;;  %v323_v9 = vmul.f32 %v989_v2, %v1249_v56 }
  0xeb   :  { %v200_v5 = vpop.f32.mrf.mxu2  ;;  %v224_v6 = vpop.f32.mrf.mxu3 }
  0xec   :  { %v991_v7 = vpop.eup %990  ;;  %v257_v10 = vadd.f32 %v1244_v55, %v200_v5  ;;  %v265_v11 = vadd.f32 %v1244_v55, %v224_v6 }
  0xed   :  { %v993_v12 = vpop.eup %992  ;;  %v324_v49 = vmul.f32 %v991_v7, %v1249_v56 }
  0xee   :  { %v995_v13 = vpop.eup %994  ;;  %998 = vtanh.f32 %v257_v10  ;;  %v309_v14 = vmul.f32 %v993_v12, %v1249_v56 }
  0xef   :  { %344 = vadd.xlane.f32.xlu2 %v307_v4  ;;  %1000 = vtanh.f32 %v265_v11  ;;  %v332_v15 = vmul.f32 %v995_v13, %v1249_v56 }
  0xf0   :  { %v997_v17 = vpop.eup %996  ;;  %390 = vadd.xlane.f32.xlu1 %v330_v8  ;;  %376 = vadd.xlane.f32.xlu0 %v323_v9 }
  0xf1   :  { %v317_v18 = vmul.f32 %v997_v17, %v1249_v56 }
  0xf4   :  { %v999_v19 = vpop.eup %998 }
  0xf5   :  { %v1001_v21 = vpop.eup %1000  ;;  %v325_v55 = vmul.f32 %v999_v19, %v1249_v56 }
  0xf6   :  { %v333_v22 = vmul.f32 %v1001_v21, %v1249_v56 }
  0xf7   :  { %362 = vadd.xlane.f32.xlu2 %v316_v3 }
  0xf8   :  { %360 = vadd.xlane.f32.xlu1 %v315_v39  ;;  %346 = vadd.xlane.f32.xlu0 %v308_v60  ;;  %v1346_v60 = vand.u32 127, %v398_v54 }
  0xfa   :  { %v434_v61 = vadd.s32 4294967288, %v1346_v60  ;;  %v438_v62 = vadd.s32 4294967280, %v1346_v60  ;;  %v442_v1 = vadd.s32 4294967272, %v1346_v60  ;;  %v446_v7 = vadd.s32 4294967264, %v1346_v60 }
  0xfb   :  { %v450_v9 = vadd.s32 4294967256, %v1346_v60  ;;  %v458_v10 = vadd.s32 4294967240, %v1346_v60  ;;  %v1363_v11 = vadd.s32 4294967232, %v1346_v60  ;;  %v1367_v13 = vadd.s32 4294967224, %v1346_v60 }
  0xfc   :  { %v1377_v21 = vadd.s32 4294967208, %v1346_v60 }
  0xff   :  { %380 = vadd.xlane.f32.xlu2 %v325_v55  ;;  %v454_v55 = vadd.s32 4294967248, %v1346_v60 }
 0x100   :  { %378 = vadd.xlane.f32.xlu1 %v324_v49  ;;  %364 = vadd.xlane.f32.xlu0 %v317_v18 }
 0x107   :  { %392 = vadd.xlane.f32.xlu2 %v331_v63 }
 0x108   :  { %348 = vadd.xlane.f32.xlu1 %v309_v14  ;;  %394 = vadd.xlane.f32.xlu0 %v332_v15  ;;  %v1370_v14 = vadd.s32 4294967216, %v1346_v60 }
 0x110   :  { %396 = vadd.xlane.f32.xlu1 %v333_v22 }
 0x12b   :  { %v1313_v23 = vpop.xlane.xlu0 %334 }
 0x12c   :  { %v433_v18 = vperm.slane %v1313_v23, %v1346_v60 }
 0x12e   :  { %v1315_v25 = vpop.xlane.xlu2 %350 }
 0x132   :  { %v367_v27 = vpop.xlane.xlu1 %366 }
 0x133   :  { %v1317_v30 = vpop.xlane.xlu0 %382  ;;  %v494_v5 = vperm.slane %v367_v27, %v1346_v60 }
 0x13a   :  { %v369_v31 = vpop.xlane.xlu2 %368 }
 0x13b   :  { %v1319_v34 = vpop.xlane.xlu1 %384  ;;  %v1321_v56 = vpop.xlane.xlu0 %336  ;;  %v495_v0 = vperm.slane %v369_v31, %v434_v61 }
 0x13c   :  { %v435_v19 = vperm.slane %v1321_v56, %v434_v61  ;;  %v509_v56 = vperm.slane %v1317_v30, %v1363_v11 }
 0x13d   :  { %v496_v8 = vsel %vm436_vm0, %v495_v0, %v494_v5 }
 0x142   :  { %v1323_v35 = vpop.xlane.xlu2 %386 }
 0x143   :  { %v1325_v38 = vpop.xlane.xlu1 %338  ;;  %v1327_v39 = vpop.xlane.xlu0 %352  ;;  %v513_v30 = vperm.slane %v1323_v35, %v1370_v14  ;;  %v478_v35 = vadd.s32 4294967200, %v1346_v60 }
 0x144   :  { %v439_v27 = vperm.slane %v1325_v38, %v438_v62  ;;  %v511_v38 = vperm.slane %v1319_v34, %v1367_v13 }
 0x14a   :  { %v1329_v42 = vpop.xlane.xlu2 %356 }
 0x14b   :  { %v1331_v43 = vpop.xlane.xlu1 %354  ;;  %v371_v46 = vpop.xlane.xlu0 %370 }
 0x14c   :  { %v497_v4 = vperm.slane %v371_v46, %v438_v62  ;;  %v437_v62 = vsel %vm436_vm0, %v435_v19, %v433_v18  ;;  %v463_v19 = vperm.slane %v1315_v25, %v1363_v11  ;;  %v490_v11 = vadd.s32 4294967176, %v1346_v60 }
 0x14d   :  { %v441_v0 = vsel %vm440_vm1, %v439_v27, %v437_v62  ;;  %v471_v27 = vperm.slane %v1331_v43, %v1370_v14  ;;  %vm400_vm0 = vcmp.lt.s32.totalorder %v1346_v60, 8 }
 0x14e   :  { %v498_v12 = vsel %vm440_vm1, %v497_v4, %v496_v8  ;;  %vm529_vm1 = vcmask 1041408  }
 0x152   :  { %v1333_v47 = vpop.xlane.xlu2 %342 }
 0x153   :  { %v1335_v48 = vpop.xlane.xlu1 %340  ;;  %v1337_v50 = vpop.xlane.xlu0 %388 }
 0x15a   :  { %v375_v51 = vpop.xlane.xlu2 %374 }
 0x15b   :  { %v373_v52 = vpop.xlane.xlu1 %372  ;;  %v1339_v53 = vpop.xlane.xlu0 %358  ;;  %v501_v49 = vperm.slane %v375_v51, %v446_v7  ;;  %v443_v51 = vperm.slane %v1335_v48, %v442_v1 }
 0x15c   :  { %v499_v6 = vperm.slane %v373_v52, %v442_v1  ;;  %v447_v1 = vperm.slane %v1333_v47, %v446_v7  ;;  %v515_v47 = vperm.slane %v1337_v50, %v1377_v21  ;;  %v479_v43 = vperm.slane %v1339_v53, %v478_v35 }
 0x15d   :  { %v445_v5 = vsel %vm444_vm2, %v443_v51, %v441_v0 }
 0x15e   :  { %v500_v15 = vsel %vm444_vm2, %v499_v6, %v498_v12 }
 0x15f   :  { %v502_v52 = vsel %vm448_vm3, %v501_v49, %v500_v15  ;;  %v449_v49 = vsel %vm448_vm3, %v447_v1, %v445_v5  ;;  %v482_v15 = vadd.s32 4294967192, %v1346_v60 }
 0x162   :  { %v1341_v57 = vpop.xlane.xlu2 %344 }
 0x163   :  { %v1343_v58 = vpop.xlane.xlu1 %390  ;;  %v377_v59 = vpop.xlane.xlu0 %376  ;;  %v451_v6 = vperm.slane %v1341_v57, %v450_v9 }
 0x164   :  { %v503_v17 = vperm.slane %v377_v59, %v450_v9  ;;  %v517_v50 = vperm.slane %v1343_v58, %v478_v35  ;;  %v475_v58 = vperm.slane %v1329_v42, %v1377_v21 }
 0x165   :  { %v453_v9 = vsel %vm452_vm4, %v451_v6, %v449_v49 }
 0x166   :  { %v504_v61 = vsel %vm452_vm4, %v503_v17, %v502_v52  ;;  %v486_v52 = vadd.s32 4294967184, %v1346_v60 }
 0x16a   :  { %v1350_v63 = vpop.xlane.xlu2 %362 }
 0x16b   :  { %v1353_v2 = vpop.xlane.xlu1 %360  ;;  %v1355_v3 = vpop.xlane.xlu0 %346 }
 0x16c   :  { %v455_v8 = vperm.slane %v1355_v3, %v454_v55 }
 0x172   :  { %v381_v22 = vpop.xlane.xlu2 %380 }
 0x173   :  { %v379_v31 = vpop.xlane.xlu1 %378  ;;  %v507_v46 = vperm.slane %v381_v22, %v458_v10  ;;  %v1383_v23 = vpop.xlane.xlu0 %364  ;;  %v467_v22 = vperm.slane %v1327_v39, %v1367_v13 }
 0x174   :  { %v505_v59 = vperm.slane %v379_v31, %v454_v55  ;;  %v457_v55 = vsel %vm456_vm6, %v455_v8, %v453_v9  ;;  %v491_v21 = vperm.slane %v1383_v23, %v490_v11 }
 0x176   :  { %v506_v48 = vsel %vm456_vm6, %v505_v59, %v504_v61  ;;  %v483_v59 = vperm.slane %v1353_v2, %v482_v15 }
 0x177   :  { %v508_v4 = vsel %vm460_vm5, %v507_v46, %v506_v48 }
 0x178   :  { %v510_v34 = vsel %vm464_vm7, %v509_v56, %v508_v4 }
 0x179   :  { %v512_v12 = vsel %vm468_vm8, %v511_v38, %v510_v34  ;;  %v487_v38 = vperm.slane %v1350_v63, %v486_v52 }
 0x17a   :  { %v514_v7 = vsel %vm472_vm9, %v513_v30, %v512_v12  ;;  %v393_v17 = vpop.xlane.xlu2 %392 }
 0x17b   :  { %v349_v57 = vpop.xlane.xlu1 %348  ;;  %v516_v3 = vsel %vm476_vm10, %v515_v47, %v514_v7  ;;  %v519_v31 = vperm.slane %v393_v17, %v482_v15  ;;  %v395_v51 = vpop.xlane.xlu0 %394  ;;  %v544_v47 = vshrl.u32 %v398_v54, 7 }
 0x17c   :  { %v459_v18 = vperm.slane %v349_v57, %v458_v10  ;;  %v518_v10 = vsel %vm480_vm11, %v517_v50, %v516_v3  ;;  %v521_v14 = vperm.slane %v395_v51, %v486_v52 }
 0x17d   :  { %v520_v56 = vsel %vm484_vm12, %v519_v31, %v518_v10  ;;  %904 = vset.pattern.permute.xlu1 %v544_v47  ;;  %v557_v60 = vadd.s32 16, %v544_v47  ;;  %v551_v7 = vadd.s32 8, %v544_v47  ;;  %v1438_v57 = vadd.s32 72, %v544_v47 }
 0x17e   :  { %v461_v46 = vsel %vm460_vm5, %v459_v18, %v457_v55  ;;  %v522_v0 = vsel %vm488_vm13, %v521_v14, %v520_v56  ;;  %v563_v9 = vadd.s32 24, %v544_v47  ;;  %v569_v3 = vadd.s32 32, %v544_v47 }
 0x17f   :  { %v465_v25 = vsel %vm464_vm7, %v463_v19, %v461_v46  ;;  %906 = vset.pattern.permute.xlu0 %v557_v60  ;;  %905 = vset.pattern.permute.xlu2 %v551_v7  ;;  %v1441_v54 = vadd.s32 112, %v544_v47  ;;  %v575_v18 = vadd.s32 40, %v544_v47  ;;  %v581_v19 = vadd.s32 48, %v544_v47 }
 0x180   :  { %v469_v39 = vsel %vm468_vm8, %v467_v22, %v465_v25  ;;  %v587_v50 = vadd.s32 56, %v544_v47  ;;  %v593_v55 = vadd.s32 64, %v544_v47  ;;  %v611_v31 = vadd.s32 88, %v544_v47 }
 0x181   :  { %v473_v13 = vsel %vm472_vm9, %v471_v27, %v469_v39  ;;  %v605_v27 = vadd.s32 80, %v544_v47  ;;  %v623_v46 = vadd.s32 104, %v544_v47  ;;  %v617_v51 = vadd.s32 96, %v544_v47 }
 0x182   :  { %v477_v61 = vsel %vm476_vm10, %v475_v58, %v473_v13  ;;  %v635_v52 = vadd.s32 120, %v544_v47 }
 0x183   :  { %v397_v62 = vpop.xlane.xlu1 %396  ;;  %v481_v42 = vsel %vm480_vm11, %v479_v43, %v477_v61 }
 0x184   :  { %v523_v48 = vperm.slane %v397_v62, %v490_v11  ;;  %v485_v53 = vsel %vm484_vm12, %v483_v59, %v481_v42 }
 0x185   :  { %v489_v2 = vsel %vm488_vm13, %v487_v38, %v485_v53 }
 0x186   :  { %v493_v1 = vsel %vm492_vm14, %v491_v21, %v489_v2  ;;  %v524_v4 = vsel %vm492_vm14, %v523_v48, %v522_v0 }
 0x187   :  { %v526_v30 = vsel %vm525_vm15, %v524_v4, %v493_v1 }
 0x188   :  { %v528_v63 = vsel %vm400_vm0, %v526_v30, -inf }
 0x189   :  { %v530_v5 = vsel %vm529_vm1, %v528_v63, -inf }
 0x18a   :  { %531 = vmax.xlane.f32.xlu2 %v530_v5  ;;  %v1006_v5 = vld [vmem:[#allocation2 + $0x80] sm:$0xff] }
 0x1fd   :  { %v532_v6 = vpop.xlane.xlu2 %531 }
 0x1fe   :  { %v533_v34 = vsub.f32 %v528_v63, %v532_v6 }
 0x200   :  { %v534_v8 = vmul.f32 1.442695, %v533_v34 }
 0x202   :  { %1002 = vpow2.f32 %v534_v8 }
 0x208   :  { %v1003_v23 = vpop.eup %1002 }
 0x209   :  { %v536_v12 = vsel %vm529_vm1, %v1003_v23, 0.0 }
 0x20a   :  { %537 = vadd.xlane.f32.xlu0 %v536_v12 }
 0x27d   :  { %v538_v49 = vpop.xlane.xlu0 %537 }
 0x27e   :  { %1004 = vrcp.f32 %v538_v49 }
 0x284   :  { %v1005_v35 = vpop.eup %1004 }
 0x285   :  { %v540_v15 = vmul.f32 %v1005_v35, %v1003_v23  ;;  %v1007_v23 = vld [vmem:[#allocation2 + $0x88] sm:$0xff] }
 0x287   :  { %v542_v17 = vperm.slane %v540_v15, 0  ;;  %541 = vst [vmem:[#allocation8] sm:$0x3] %v540_v15  ;;  %v639_v22 = vperm.slane %v540_v15, 1 }
 0x288   :  { %825 = dma.vmem_to_hbm [thread:$0]  %s821_s12, 32, %s823_s10, [#allocation4]  }
 0x289   :  { %559 = vperm.xlu0 %906, %v542_v17   ;;  %553 = vperm.xlu2 %905, %v542_v17  }
 0x28a   :  { %547 = vperm.xlu1 %904, %v542_v17  }
 0x291   :  { %913 = vset.pattern.permute.xlu0 %v1438_v57  ;;  %907 = vset.pattern.permute.xlu2 %v563_v9 }
 0x292   :  { %908 = vset.pattern.permute.xlu1 %v569_v3 }
 0x299   :  { %601 = vperm.xlu0 %913, %v542_v17   ;;  %565 = vperm.xlu2 %907, %v542_v17  }
 0x29a   :  { %571 = vperm.xlu1 %908, %v542_v17  }
 0x2a1   :  { %918 = vset.pattern.permute.xlu0 %v1441_v54  ;;  %909 = vset.pattern.permute.xlu2 %v575_v18 }
 0x2a2   :  { %910 = vset.pattern.permute.xlu1 %v581_v19 }
 0x2a9   :  { %631 = vperm.xlu0 %918, %v542_v17   ;;  %577 = vperm.xlu2 %909, %v542_v17  }
 0x2aa   :  { %583 = vperm.xlu1 %910, %v542_v17  }
 0x2b1   :  { %923 = vset.pattern.permute.xlu0 %v563_v9  ;;  %911 = vset.pattern.permute.xlu2 %v587_v50 }
 0x2b2   :  { %912 = vset.pattern.permute.xlu1 %v593_v55 }
 0x2b9   :  { %662 = vperm.xlu0 %923, %v639_v22   ;;  %589 = vperm.xlu2 %911, %v542_v17  }
 0x2ba   :  { %595 = vperm.xlu1 %912, %v542_v17  }
 0x2c1   :  { %928 = vset.pattern.permute.xlu0 %v593_v55  ;;  %914 = vset.pattern.permute.xlu2 %v605_v27  ;;  %v1009_v55 = vld [vmem:[#allocation2 + $0x48] sm:$0xff] }
 0x2c2   :  { %915 = vset.pattern.permute.xlu1 %v611_v31 }
 0x2c9   :  { %692 = vperm.xlu0 %928, %v639_v22   ;;  %607 = vperm.xlu2 %914, %v542_v17  }
 0x2ca   :  { %613 = vperm.xlu1 %915, %v542_v17  }
 0x2d1   :  { %933 = vset.pattern.permute.xlu0 %v623_v46  ;;  %916 = vset.pattern.permute.xlu2 %v617_v51 }
 0x2d2   :  { %917 = vset.pattern.permute.xlu1 %v623_v46 }
 0x2d9   :  { %722 = vperm.xlu0 %933, %v639_v22   ;;  %619 = vperm.xlu2 %916, %v542_v17  }
 0x2da   :  { %625 = vperm.xlu1 %917, %v542_v17  }
 0x2e1   :  { %919 = vset.pattern.permute.xlu2 %v635_v52  ;;  %936 = vset.pattern.permute.xlu0 %v635_v52 }
 0x2e2   :  { %920 = vset.pattern.permute.xlu1 %v544_v47 }
 0x2e3   :  { %v554_v10 = vpop.permute.xlu2 %553 }
 0x2e4   :  { %v737_v11 = vmul.f32 %v554_v10, %v1201_v20  ;;  %v1010_v10 = vld [vmem:[#allocation2 + $0x50] sm:$0xff] }
 0x2e9   :  { %637 = vperm.xlu2 %919, %v542_v17  }
 0x2ea   :  { %644 = vperm.xlu1 %920, %v639_v22  }
 0x2f1   :  { %921 = vset.pattern.permute.xlu2 %v551_v7 }
 0x2f2   :  { %922 = vset.pattern.permute.xlu1 %v557_v60 }
 0x2f3   :  { %v566_v43 = vpop.permute.xlu2 %565 }
 0x2f4   :  { %v739_v59 = vmul.f32 %v566_v43, %v1210_v28 }
 0x2f9   :  { %650 = vperm.xlu2 %921, %v639_v22  }
 0x2fa   :  { %656 = vperm.xlu1 %922, %v639_v22  }
 0x2fb   :  { %v560_v25 = vpop.permute.xlu0 %559 }
 0x2fc   :  { %v548_v58 = vpop.permute.xlu1 %547  ;;  %v738_v13 = vmul.f32 %v560_v25, %v1204_v24  ;;  %v1011_v25 = vld [vmem:[#allocation2 + $0x58] sm:$0xff] }
 0x2fd   :  { %v736_v39 = vmul.f32 %v548_v58, %v1198_v16 }
 0x2ff   :  { %v768_v14 = vadd.f32 %v737_v11, %v736_v39 }
 0x301   :  { %v769_v56 = vadd.f32 %v768_v14, %v738_v13  ;;  %924 = vset.pattern.permute.xlu2 %v569_v3 }
 0x302   :  { %925 = vset.pattern.permute.xlu1 %v575_v18 }
 0x303   :  { %v770_v61 = vadd.f32 %v769_v56, %v739_v59  ;;  %v578_v16 = vpop.permute.xlu2 %577  ;;  %v1012_v56 = vld [vmem:[#allocation2 + $0x60] sm:$0xff] }
 0x304   :  { %v741_v34 = vmul.f32 %v578_v16, %v1222_v36 }
 0x309   :  { %668 = vperm.xlu2 %924, %v639_v22  }
 0x30a   :  { %674 = vperm.xlu1 %925, %v639_v22  }
 0x30b   :  { %v602_v0 = vpop.permute.xlu0 %601 }
 0x30c   :  { %v572_v38 = vpop.permute.xlu1 %571 }
 0x30d   :  { %v740_v62 = vmul.f32 %v572_v38, %v1216_v32  ;;  %v1013_v38 = vld [vmem:[#allocation2 + $0xc0] sm:$0xff] }
 0x30f   :  { %v771_v42 = vadd.f32 %v770_v61, %v740_v62 }
 0x311   :  { %926 = vset.pattern.permute.xlu2 %v581_v19  ;;  %v772_v60 = vadd.f32 %v771_v42, %v741_v34  ;;  %v1014_v42 = vld [vmem:[#allocation2 + $0x68] sm:$0xff] }
 0x312   :  { %927 = vset.pattern.permute.xlu1 %v587_v50 }
 0x313   :  { %v590_v24 = vpop.permute.xlu2 %589 }
 0x314   :  { %v743_v9 = vmul.f32 %v590_v24, %v1234_v44 }
 0x319   :  { %680 = vperm.xlu2 %926, %v639_v22  }
 0x31a   :  { %686 = vperm.xlu1 %927, %v639_v22  }
 0x31b   :  { %v632_v4 = vpop.permute.xlu0 %631 }
 0x31c   :  { %v584_v20 = vpop.permute.xlu1 %583 }
 0x31d   :  { %v742_v8 = vmul.f32 %v584_v20, %v1228_v40 }
 0x31f   :  { %v773_v35 = vadd.f32 %v772_v60, %v742_v8  ;;  %v1018_v8 = vld [vmem:[#allocation2 + $0x78] sm:$0xff] }
 0x321   :  { %929 = vset.pattern.permute.xlu2 %v1438_v57  ;;  %v774_v36 = vadd.f32 %v773_v35, %v743_v9 }
 0x322   :  { %930 = vset.pattern.permute.xlu1 %v605_v27 }
 0x323   :  { %v608_v32 = vpop.permute.xlu2 %607 }
 0x324   :  { %v746_v44 = vmul.f32 %v1010_v10, %v608_v32  ;;  %v1015_v32 = vld [vmem:[#allocation2 + $0xc8] sm:$0xff] }
 0x329   :  { %698 = vperm.xlu2 %929, %v639_v22  }
 0x32a   :  { %704 = vperm.xlu1 %930, %v639_v22  }
 0x32b   :  { %v663_v49 = vpop.permute.xlu0 %662 }
 0x32c   :  { %v596_v28 = vpop.permute.xlu1 %595  ;;  %v755_v3 = vmul.f32 %v663_v49, %v1212_v29 }
 0x331   :  { %931 = vset.pattern.permute.xlu2 %v611_v31 }
 0x332   :  { %932 = vset.pattern.permute.xlu1 %v617_v51 }
 0x333   :  { %v620_v48 = vpop.permute.xlu2 %619 }
 0x334   :  { %v748_v61 = vmul.f32 %v1012_v56, %v620_v48 }
 0x339   :  { %710 = vperm.xlu2 %931, %v639_v22  }
 0x33a   :  { %716 = vperm.xlu1 %932, %v639_v22  }
 0x33c   :  { %v614_v21 = vpop.permute.xlu1 %613 }
 0x33d   :  { %v747_v29 = vmul.f32 %v1011_v25, %v614_v21  ;;  %v1016_v21 = vld [vmem:[#allocation2 + $0xd0] sm:$0xff] }
 0x341   :  { %934 = vset.pattern.permute.xlu2 %v1441_v54  ;;  %v1008_v54 = vld [vmem:[#allocation2 + $0x40] sm:$0xff] }
 0x342   :  { %935 = vset.pattern.permute.xlu1 %v635_v52  ;;  %v744_v18 = vmul.f32 %v1008_v54, %v596_v28  ;;  %v1022_v54 = vld [vmem:[#allocation2 + $0xf0] sm:$0xff] }
 0x343   :  { %v1454_v2 = vpop.permute.xlu2 %637 }
 0x344   :  { %v775_v40 = vadd.f32 %v774_v36, %v744_v18  ;;  %v751_v48 = vmul.f32 %v1018_v8, %v1454_v2 }
 0x349   :  { %728 = vperm.xlu2 %934, %v639_v22  }
 0x34a   :  { %734 = vperm.xlu1 %935, %v639_v22   ;;  %v745_v22 = vmul.f32 %v1009_v55, %v602_v0  ;;  %v1017_v0 = vld [vmem:[#allocation2 + $0x70] sm:$0xff] }
 0x34c   :  { %v626_v53 = vpop.permute.xlu1 %625  ;;  %v776_v51 = vadd.f32 %v775_v40, %v745_v22  ;;  %v1023_v40 = vld [vmem:[#allocation2 + $0xf8] sm:$0xff] }
 0x34d   :  { %v749_v16 = vmul.f32 %v1014_v42, %v626_v53  ;;  %v1020_v53 = vld [vmem:[#allocation2 + $0xe0] sm:$0xff] }
 0x34e   :  { %v777_v39 = vadd.f32 %v776_v51, %v746_v44 }
 0x350   :  { %v778_v13 = vadd.f32 %v777_v39, %v747_v29 }
 0x352   :  { %v779_v20 = vadd.f32 %v778_v13, %v748_v61 }
 0x353   :  { %v651_v30 = vpop.permute.xlu2 %650 }
 0x354   :  { %v753_v12 = vmul.f32 %v1007_v23, %v651_v30  ;;  %v780_v28 = vadd.f32 %v779_v20, %v749_v16  ;;  %v1019_v23 = vld [vmem:[#allocation2 + $0xd8] sm:$0xff] }
 0x35c   :  { %v645_v1 = vpop.permute.xlu1 %644 }
 0x35d   :  { %v752_v6 = vmul.f32 %v1006_v5, %v645_v1  ;;  %v750_v1 = vmul.f32 %v1017_v0, %v632_v4 }
 0x35f   :  { %v789_v7 = vadd.f32 %v753_v12, %v752_v6  ;;  %v781_v6 = vadd.f32 %v780_v28, %v750_v1 }
 0x361   :  { %v782_v60 = vadd.f32 %v781_v6, %v751_v48 }
 0x363   :  { %v669_v17 = vpop.permute.xlu2 %668 }
 0x364   :  { %v756_v50 = vmul.f32 %v669_v17, %v1218_v33  ;;  %v693_v33 = vpop.permute.xlu0 %692 }
 0x365   :  { %v760_v62 = vmul.f32 %v1013_v38, %v693_v33 }
 0x36c   :  { %v657_v63 = vpop.permute.xlu1 %656  ;;  %v723_v49 = vpop.permute.xlu0 %722 }
 0x36d   :  { %v754_v47 = vmul.f32 %v657_v63, %v1206_v26 }
 0x36f   :  { %v790_v15 = vadd.f32 %v789_v7, %v754_v47 }
 0x371   :  { %v791_v19 = vadd.f32 %v790_v15, %v755_v3  ;;  %v1021_v15 = vld [vmem:[#allocation2 + $0xe8] sm:$0xff] }
 0x372   :  { %v765_v17 = vmul.f32 %v1021_v15, %v723_v49 }
 0x373   :  { %v792_v27 = vadd.f32 %v791_v19, %v756_v50  ;;  %v681_v31 = vpop.permute.xlu2 %680 }
 0x374   :  { %v758_v58 = vmul.f32 %v681_v31, %v1230_v41 }
 0x37c   :  { %v675_v57 = vpop.permute.xlu1 %674 }
 0x37d   :  { %v757_v26 = vmul.f32 %v675_v57, %v1224_v37  ;;  %v783_v57 = vrot.slane %v782_v60, 4 }
 0x37f   :  { %v793_v52 = vadd.f32 %v792_v27, %v757_v26  ;;  %v784_v3 = vadd.f32 %v783_v57, %v782_v60 }
 0x381   :  { %v794_v43 = vadd.f32 %v793_v52, %v758_v58  ;;  %v785_v50 = vrot.slane %v784_v3, 2 }
 0x383   :  { %v699_v14 = vpop.permute.xlu2 %698  ;;  %v786_v22 = vadd.f32 %v785_v50, %v784_v3 }
 0x384   :  { %v761_v41 = vmul.f32 %v1015_v32, %v699_v14 }
 0x385   :  { %v787_v51 = vrot.slane %v786_v22, 1 }
 0x387   :  { %v788_v44 = vadd.f32 %v787_v51, %v786_v22 }
 0x38c   :  { %v687_v46 = vpop.permute.xlu1 %686 }
 0x38d   :  { %v759_v11 = vmul.f32 %v687_v46, %v1236_v45 }
 0x38f   :  { %v795_v37 = vadd.f32 %v794_v43, %v759_v11 }
 0x391   :  { %v796_v24 = vadd.f32 %v795_v37, %v760_v62 }
 0x393   :  { %v797_v30 = vadd.f32 %v796_v24, %v761_v41  ;;  %v711_v63 = vpop.permute.xlu2 %710 }
 0x394   :  { %v763_v12 = vmul.f32 %v1019_v23, %v711_v63 }
 0x39c   :  { %v705_v59 = vpop.permute.xlu1 %704 }
 0x39d   :  { %v762_v45 = vmul.f32 %v1016_v21, %v705_v59 }
 0x39f   :  { %v798_v34 = vadd.f32 %v797_v30, %v762_v45 }
 0x3a1   :  { %v799_v7 = vadd.f32 %v798_v34, %v763_v12 }
 0x3a3   :  { %v729_v4 = vpop.permute.xlu2 %728 }
 0x3a4   :  { %v766_v18 = vmul.f32 %v1022_v54, %v729_v4 }
 0x3ac   :  { %v717_v5 = vpop.permute.xlu1 %716 }
 0x3ad   :  { %v764_v47 = vmul.f32 %v1020_v53, %v717_v5 }
 0x3af   :  { %v800_v35 = vadd.f32 %v799_v7, %v764_v47 }
 0x3b1   :  { %v801_v9 = vadd.f32 %v800_v35, %v765_v17 }
 0x3b3   :  { %v802_v19 = vadd.f32 %v801_v9, %v766_v18 }
 0x3bc   :  { %v735_v36 = vpop.permute.xlu1 %734 }
 0x3bd   :  { %v767_v2 = vmul.f32 %v1023_v40, %v735_v36 }
 0x3bf   :  { %v803_v26 = vadd.f32 %v802_v19, %v767_v2 }
 0x3c1   :  { %v804_v55 = vrot.slane %v803_v26, 4 }
 0x3c3   :  { %v805_v27 = vadd.f32 %v804_v55, %v803_v26 }
 0x3c5   :  { %v806_v31 = vrot.slane %v805_v27, 2 }
 0x3c7   :  { %v807_v46 = vadd.f32 %v806_v31, %v805_v27 }
 0x3c9   :  { %v808_v52 = vrot.slane %v807_v46, 1 }
 0x3cb   :  { %v809_v10 = vadd.f32 %v808_v52, %v807_v46 }
 0x3cd   :  { %v812_v25 = vsel %vm525_vm15, %v809_v10, %v788_v44 }
 0x3ce   :  { %814 = vst [vmem:[#allocation9] sm:$0x3] %v812_v25 }
 0x3cf   :  { %836 = dma.vmem_to_hbm [thread:$0]  %s832_s13, 32, %s834_s16, [#allocation10]  }
 0x3d0   :  { %1148 = dma.done.wait [#allocation4], 32  }
 0x3d1   :  { %1149 = vsyncadd [#allocation4], 4294967264 }
 0x3d2   :  { %1150 = dma.done.wait [#allocation10], 32  }
 0x3d3   :  { %1151 = vsyncadd [#allocation10], 4294967264 }
 0x3d4   :  { %845 = vsyncpa [#allocation3], 1 }
 0x3d5   :  { %846 = vsyncpa [#allocation6], 1 }
 0x3d6   :  { %847 = vsyncpa [#allocation4], 1 }
 0x3d7   :  { %848 = vsyncpa [#allocation10], 1 }

</bundles_post_ra>
